<compile_context>
chip_gen: v6e
topology: v6e:2x2x1
jax: 0.10.0
libtpu: 0.0.40
codegen_flags: <defaults>
</compile_context>

<pallas_src>
import functools

import jax
import jax.numpy as jnp
from jax.experimental import pallas as pl
from jax.experimental.pallas import tpu as pltpu


def _round_up(x, m):
    return ((x + m - 1) // m) * m


def _mlp_kernel(x_ref, w1_ref, b1_ref, w2_ref, b2_ref, out_ref, *, apply_sigmoid):
    # Layer 1: cast x tile f32->bf16 (VPU, hidden under DMA), MXU matmul with
    # f32 accumulation, bias + ReLU in f32.
    x = x_ref[...].astype(jnp.bfloat16)
    h = jnp.dot(x, w1_ref[...], preferred_element_type=jnp.float32)
    h = jnp.maximum(h + b1_ref[...], 0.0)
    # Layer 2: bf16 matmul, f32 accumulation, bias (+ sigmoid head).
    y = jnp.dot(h.astype(jnp.bfloat16), w2_ref[...],
                preferred_element_type=jnp.float32)
    y = y + b2_ref[...]
    if apply_sigmoid:
        y = jax.nn.sigmoid(y)
    out_ref[...] = y.astype(out_ref.dtype)


def prepare_params(params):
    """One-time prep: cast weights to bf16, biases to f32 row vectors."""
    w1, b1, w2, b2 = params  # weights stored (in, out)
    return (w1.astype(jnp.bfloat16),
            b1.reshape(1, -1).astype(jnp.float32),
            w2.astype(jnp.bfloat16),
            b2.reshape(1, -1).astype(jnp.float32))


@functools.partial(jax.jit, static_argnames=("binary", "tile_b"))
def mlp_forward(x, prepared_params, *, binary=False, tile_b=2048):
    """Fused Pallas MLP forward. x: (B, n_features) f32 -> (B, n_out) f32."""
    w1, b1, w2, b2 = prepared_params
    B, F = x.shape
    H = w1.shape[1]
    C = w2.shape[1]

    x = x.astype(jnp.float32)

    # Batch tile: multiple of 8 (sublane rule), no larger than the batch
    # itself (rounded up).  The grid handles a ragged last block.
    TILE_B = max(8, min(_round_up(tile_b, 8), _round_up(B, 8)))
    grid = (pl.cdiv(B, TILE_B),)

    # VMEM limit derived from the chip (v5e/v6e: 128 MiB, v7x: 64 MiB).
    try:
        vmem_cap = pltpu.get_tpu_info().vmem_capacity_bytes
    except Exception:
        vmem_cap = 64 * 1024 * 1024
    vmem_limit = min(int(0.75 * vmem_cap), 100 * 1024 * 1024)

    cost = pl.CostEstimate(
        flops=2 * B * (F * H + H * C),
        transcendentals=(B * C if binary else 0),
        bytes_accessed=(B * F * 4 + F * H * 2 + H * 4
                        + H * C * 2 + C * 4 + B * C * 4),
    )

    kernel = functools.partial(_mlp_kernel, apply_sigmoid=binary)

    return pl.pallas_call(
        kernel,
        out_shape=jax.ShapeDtypeStruct((B, C), jnp.float32),
        grid=grid,
        in_specs=[
            pl.BlockSpec((TILE_B, F), lambda i: (i, 0)),  # x tile (pipelined)
            pl.BlockSpec((F, H), lambda i: (0, 0)),       # W1 (VMEM-resident)
            pl.BlockSpec((1, H), lambda i: (0, 0)),       # b1
            pl.BlockSpec((H, C), lambda i: (0, 0)),       # W2
            pl.BlockSpec((1, C), lambda i: (0, 0)),       # b2
        ],
        out_specs=pl.BlockSpec((TILE_B, C), lambda i: (i, 0)),
        compiler_params=pltpu.CompilerParams(
            dimension_semantics=("parallel",),
            vmem_limit_bytes=vmem_limit,
        ),
        cost_estimate=cost,
    )(x, w1, b1, w2, b2)


def init_params(key, n_features, n_classes, binary=False):
    """PyTorch nn.Linear-style init; weights stored as (in, out)."""
    out2 = 1 if binary else n_classes
    dims = [(n_features, n_features), (n_features, out2)]
    params = []
    for fan_in, fan_out in dims:
        key, kw, kb = jax.random.split(key, 3)
        bound = 1.0 / jnp.sqrt(jnp.float32(fan_in))
        w = jax.random.uniform(kw, (fan_in, fan_out), jnp.float32, -bound, bound)
        b = jax.random.uniform(kb, (fan_out,), jnp.float32, -bound, bound)
        params += [w, b]
    return params


def reference_forward(x, params, binary=False):
    """Plain-JAX reference using the same bf16-matmul / f32-accumulate recipe."""
    w1, b1, w2, b2 = params
    h = jnp.dot(x.astype(jnp.bfloat16), w1.astype(jnp.bfloat16),
                preferred_element_type=jnp.float32) + b1.reshape(1, -1)
    h = jnp.maximum(h, 0.0)
    y = jnp.dot(h.astype(jnp.bfloat16), w2.astype(jnp.bfloat16),
                preferred_element_type=jnp.float32) + b2.reshape(1, -1)
    if binary:
        y = jax.nn.sigmoid(y)
    return y


if __name__ == "__main__":
    # Small shapes consistent with the module: batch=16, n_features=32, n_classes=10.
    B, n_features, n_classes = 16, 32, 10

    key = jax.random.PRNGKey(0)
    kx, kp1, kp2 = jax.random.split(key, 3)
    x = jax.random.normal(kx, (B, n_features), jnp.float32)

    # --- non-binary path (Identity head) ---
    params = init_params(kp1, n_features, n_classes, binary=False)
    prepared = prepare_params(params)           # one-time weight cast/reshape
    y = jax.block_until_ready(mlp_forward(x, prepared, binary=False))
    y_ref = reference_forward(x, params, binary=False)
    assert y.shape == (B, n_classes)
    assert jnp.allclose(y, y_ref, atol=2e-3, rtol=2e-3)

    # --- binary path (Sigmoid head, single output) ---
    params_b = init_params(kp2, n_features, n_classes, binary=True)
    prepared_b = prepare_params(params_b)
    yb = jax.block_until_ready(mlp_forward(x, prepared_b, binary=True))
    yb_ref = reference_forward(x, params_b, binary=True)
    assert yb.shape == (B, 1)
    assert jnp.allclose(yb, yb_ref, atol=2e-3, rtol=2e-3)

    print("KERNEL_OK")
</pallas_src>

<mosaic_0001>
module attributes {stable_mosaic.version = 11 : i64} {
  func.func @_mlp_kernel(%arg0: i32, %arg1: memref<16x32xf32, #tpu.memory_space<vmem>>, %arg2: memref<32x32xbf16, #tpu.memory_space<vmem>>, %arg3: memref<1x32xf32, #tpu.memory_space<vmem>>, %arg4: memref<32x10xbf16, #tpu.memory_space<vmem>>, %arg5: memref<1x10xf32, #tpu.memory_space<vmem>>, %arg6: memref<16x10xf32, #tpu.memory_space<vmem>>) attributes {dimension_semantics = [#tpu.dimension_semantics<parallel>], iteration_bounds = array<i64: 1>, scalar_prefetch = 0 : i64, scratch_operands = 0 : i64, tpu.core_type = #tpu.core_type<tc>, window_params = [{transform_indices = @transform_0, window_bounds = array<i64: 16, 32>}, {pipeline_mode = #tpu.pipeline_mode<synchronous>, transform_indices = @transform_1, window_bounds = array<i64: 32, 32>}, {pipeline_mode = #tpu.pipeline_mode<synchronous>, transform_indices = @transform_2, window_bounds = array<i64: 1, 32>}, {pipeline_mode = #tpu.pipeline_mode<synchronous>, transform_indices = @transform_3, window_bounds = array<i64: 32, 10>}, {pipeline_mode = #tpu.pipeline_mode<synchronous>, transform_indices = @transform_4, window_bounds = array<i64: 1, 10>}, {transform_indices = @transform_5, window_bounds = array<i64: 16, 10>}]} {
    %c0 = arith.constant 0 : index
    %c0_0 = arith.constant 0 : index
    %0 = vector.load %arg1[%c0, %c0_0] : memref<16x32xf32, #tpu.memory_space<vmem>>, vector<16x32xf32>
    %1 = arith.truncf %0 : vector<16x32xf32> to vector<16x32xbf16>
    %c0_1 = arith.constant 0 : index
    %c0_2 = arith.constant 0 : index
    %2 = vector.load %arg2[%c0_1, %c0_2] : memref<32x32xbf16, #tpu.memory_space<vmem>>, vector<32x32xbf16>
    %cst = arith.constant dense<0.000000e+00> : vector<16x32xf32>
    %3 = tpu.matmul %1, %2, %cst {dimension_numbers = #tpu.dot_dimension_numbers<[1], [0], [0], [1], [0, 0, 1, 1], [], []>} : vector<16x32xbf16>, vector<32x32xbf16>, vector<16x32xf32> -> vector<16x32xf32>
    %c0_3 = arith.constant 0 : index
    %c0_4 = arith.constant 0 : index
    %4 = vector.load %arg3[%c0_3, %c0_4] : memref<1x32xf32, #tpu.memory_space<vmem>>, vector<1x32xf32>
    %5 = vector.broadcast %4 : vector<1x32xf32> to vector<16x32xf32>
    %6 = arith.addf %3, %5 : vector<16x32xf32>
    %cst_5 = arith.constant 0.000000e+00 : f32
    %7 = vector.broadcast %cst_5 : f32 to vector<16x32xf32>
    %8 = arith.maximumf %6, %7 : vector<16x32xf32>
    %9 = arith.truncf %8 : vector<16x32xf32> to vector<16x32xbf16>
    %c0_6 = arith.constant 0 : index
    %c0_7 = arith.constant 0 : index
    %10 = vector.load %arg4[%c0_6, %c0_7] : memref<32x10xbf16, #tpu.memory_space<vmem>>, vector<32x10xbf16>
    %cst_8 = arith.constant dense<0.000000e+00> : vector<16x10xf32>
    %11 = tpu.matmul %9, %10, %cst_8 {dimension_numbers = #tpu.dot_dimension_numbers<[1], [0], [0], [1], [0, 0, 1, 1], [], []>} : vector<16x32xbf16>, vector<32x10xbf16>, vector<16x10xf32> -> vector<16x10xf32>
    %c0_9 = arith.constant 0 : index
    %c0_10 = arith.constant 0 : index
    %12 = vector.load %arg5[%c0_9, %c0_10] : memref<1x10xf32, #tpu.memory_space<vmem>>, vector<1x10xf32>
    %13 = vector.broadcast %12 : vector<1x10xf32> to vector<16x10xf32>
    %14 = arith.addf %11, %13 : vector<16x10xf32>
    %c0_11 = arith.constant 0 : index
    %c0_12 = arith.constant 0 : index
    %15 = vector.load %arg6[%c0_11, %c0_12] : memref<16x10xf32, #tpu.memory_space<vmem>>, vector<16x10xf32>
    tpu.vector_store %arg6[%c0_11, %c0_12], %14 {strides = array<i32>} : memref<16x10xf32, #tpu.memory_space<vmem>>, vector<16x10xf32>,
    return
  }
  func.func @transform_0(%arg0: i32) -> (i32, i32) {
    %c0_i32 = arith.constant 0 : i32
    %c0_i32_0 = arith.constant 0 : i32
    return %arg0, %c0_i32 : i32, i32
  }
  func.func @transform_1(%arg0: i32) -> (i32, i32) {
    %c0_i32 = arith.constant 0 : i32
    %c0_i32_0 = arith.constant 0 : i32
    %c0_i32_1 = arith.constant 0 : i32
    return %c0_i32, %c0_i32_0 : i32, i32
  }
  func.func @transform_2(%arg0: i32) -> (i32, i32) {
    %c0_i32 = arith.constant 0 : i32
    %c0_i32_0 = arith.constant 0 : i32
    %c0_i32_1 = arith.constant 0 : i32
    return %c0_i32, %c0_i32_0 : i32, i32
  }
  func.func @transform_3(%arg0: i32) -> (i32, i32) {
    %c0_i32 = arith.constant 0 : i32
    %c0_i32_0 = arith.constant 0 : i32
    %c0_i32_1 = arith.constant 0 : i32
    return %c0_i32, %c0_i32_0 : i32, i32
  }
  func.func @transform_4(%arg0: i32) -> (i32, i32) {
    %c0_i32 = arith.constant 0 : i32
    %c0_i32_0 = arith.constant 0 : i32
    %c0_i32_1 = arith.constant 0 : i32
    return %c0_i32, %c0_i32_0 : i32, i32
  }
  func.func @transform_5(%arg0: i32) -> (i32, i32) {
    %c0_i32 = arith.constant 0 : i32
    %c0_i32_0 = arith.constant 0 : i32
    return %arg0, %c0_i32 : i32, i32
  }
}

</mosaic_0001>

<bundles_post_ra>
// kernel: mlp_forward.1
= control target key start
LH: loop header
LB: loop body
LE: loop exit
PB: predicated region body
PF: predicated region fallthrough
CT: control target
= control target key end

     0   :  { %10 = vsyncpa [#allocation3], 0  ;;  %s347_s0 = inlined_call_operand.vmem [shape: f32[16,32], index: 0, kind: input, shape index: {}]   ;;  %s348_s1 = inlined_call_operand.hbm [shape: bf16[32,32], index: 1, kind: input, shape index: {}]   ;;  %s349_s2 = inlined_call_operand.vmem [shape: f32[1,32], index: 2, kind: input, shape index: {}]   ;;  %s350_s3 = inlined_call_operand.vmem [shape: bf16[32,10], index: 3, kind: input, shape index: {}]   ;;  %s351_s4 = inlined_call_operand.vmem [shape: f32[1,10], index: 4, kind: input, shape index: {}]   ;;  %s352_s5 = inlined_call_operand.hbm [shape: f32[16,10], index: 5, kind: output, shape index: {}]  }
   0x1   :  { %11 = vsyncpa [#allocation4], 0  ;;  %s283_s18 = smov [#allocation2]  }
   0x2   :  { %s19_s19 = sshll.u32 %s283_s18, 4  ;;  %s20_s19 = int_to_ptr.vmem [resolvable:$true] %s19_s19 }
   0x3   :  { %s247_s20 = scalar_lea.vmem %s20_s19, 256  ;;  %p252_p1 = scmp.lt.s32.totalorder %s20_s19, %s20_s19 }
   0x4   :  { %p248_p0 = scmp.ne.s32.totalorder %s20_s19, %s247_s20  ;;  %p253_p2 = scmp.lt.s32.totalorder %s247_s20, %s247_s20 }
   0x6   :  { %p254_p3 = por %p253_p2, %p252_p1 }
   0x8   :  { %p255_p4 = pnand %p254_p3, %p248_p0 }
   0xa   :  { %258 = shalt.err (!%p255_p4)
}
   0xb   :  { %s284_s21 = smov 64   ;;  %s285_s22 = smov 4  }
   0xc   :  { %25 = dma.hbm_to_vmem [thread:$0]  %s348_s1, 256, %s20_s19, [#allocation3], %s284_s21, %s284_s21, %s285_s22  }
   0xd   :  { %279 = dma.done.wait [#allocation3], 256  }
   0xe   :  { %280 = vsyncadd [#allocation3], 4294967040  ;;  %v286_v0 = vmov 0.0   ;;  %vm287_vm0 = vmmov 0   ;;  %v235_v1 = vld [vmem:[#allocation2 + $0x8] sm:$0xff]   ;;  %v236_v2 = vld [vmem:[#allocation2] sm:$0xff]  }
   0xf   :  { %211 = vmatprep.subr.bf16.mxu0 %v286_v0  ;;  %215 = vmatprep.mubr.msk.bf16.mxu0 %vm287_vm0, %v286_v0  ;;  %v36_v3 = vld [vmem:[%s347_s0] sm:$0xff]  ;;  %v37_v4 = vld [vmem:[%s347_s0 + $0x8] sm:$0xff]  ;;  %vm62_vm1 = vcmask 261120   ;;  %vm177_vm2 = vcmask 80896  }
  0x10   :  { %219 = vmatprep.subr.bf16.mxu1 %v286_v0  ;;  %223 = vmatprep.mubr.msk.bf16.mxu1 %vm287_vm0, %v286_v0  ;;  %v38_v5 = vpack.c.bf16 %v37_v4, %v36_v3  ;;  %v237_v6 = vld [vmem:[%s350_s3 + $0x8] sm:$0xff]   ;;  %v238_v7 = vld [vmem:[%s350_s3] sm:$0xff]   ;;  %s288_s3 = smov [#allocation5]  }
  0x11   :  { %212 = vmatpush3.bf16.msra.mxu0 %v235_v1  ;;  %220 = vmatpush3.bf16.msra.mxu1 %v237_v6  ;;  %v197_v8 = vld [vmem:[%s349_s2] ss:$0 sm:$0xff]  ;;  %s185_s2 = sshll.u32 %s288_s3, 4  ;;  %s186_s2 = int_to_ptr.vmem [resolvable:$true] %s185_s2 }
  0x12   :  { %213 = vmatprep.subr.bf16.mxu0 %v286_v0  ;;  %221 = vmatprep.subr.bf16.mxu1 %v286_v0  ;;  %v201_v18 = vld [vmem:[%s351_s4] ss:$0 sm:$0xff]  ;;  %s259_s10 = scalar_lea.vmem %s186_s2, 256  ;;  %p264_p6 = scmp.lt.s32.totalorder %s186_s2, %s186_s2 }
  0x13   :  { %p260_p5 = scmp.ne.s32.totalorder %s186_s2, %s259_s10  ;;  %p265_p7 = scmp.lt.s32.totalorder %s259_s10, %s259_s10 }
  0x15   :  { %214 = vmatpush3.bf16.msra.mxu0 %v236_v2  ;;  %222 = vmatpush3.bf16.msra.mxu1 %v238_v7  ;;  %p266_p8 = por %p265_p7, %p264_p6 }
  0x17   :  { %p267_p9 = pnand %p266_p8, %p260_p5 }
  0x18   :  { %216 = vmatmul.mubr.msk.bf16.vlgmr.msra.gmra.mxu0 %vm62_vm1, %v38_v5 }
  0xd8   :  { %v100_v9 = vpop.f32.mrf.mxu0 }
  0xd9   :  { %v101_v11 = vadd.f32 %v197_v8, %v100_v9 }
  0xda   :  { %v217_v10 = vpop.f32.mrf.mxu0 }
  0xdb   :  { %v107_v15 = vmax.f32 %v101_v11, 0.0 }
  0xdc   :  { %v103_v12 = vpop.f32.mrf.mxu0 }
  0xdd   :  { %v104_v13 = vadd.f32 %v197_v8, %v103_v12 }
  0xde   :  { %v218_v14 = vpop.f32.mrf.mxu0 }
  0xdf   :  { %v108_v16 = vmax.f32 %v104_v13, 0.0 }
  0xe1   :  { %v109_v17 = vpack.c.bf16 %v108_v16, %v107_v15 }
  0xe3   :  { %224 = vmatmul.mubr.msk.bf16.vlgmr.msra.gmra.mxu1 %vm62_vm1, %v109_v17 }
 0x1a3   :  { %v170_v19 = vpop.f32.mrf.mxu1 }
 0x1a4   :  { %v171_v20 = vadd.f32 %v201_v18, %v170_v19 }
 0x1a5   :  { %v225_v21 = vpop.f32.mrf.mxu1 }
 0x1a6   :  { %178 = vst.msk [vmem:[#allocation5] sm:$0xff] %vm177_vm2, %v171_v20 }
 0x1a7   :  { %v173_v22 = vpop.f32.mrf.mxu1 }
 0x1a8   :  { %v174_v23 = vadd.f32 %v201_v18, %v173_v22 }
 0x1a9   :  { %v226_v24 = vpop.f32.mrf.mxu1 }
 0x1aa   :  { %179 = vst.msk [vmem:[#allocation5 + $0x8] sm:$0xff] %vm177_vm2, %v174_v23 }
 0x1ab   :  { %270 = shalt.err (!%p267_p9)
}
 0x1ac   :  { %s289_s4 = smov 128   ;;  %s290_s11 = smov 8  }
 0x1ad   :  { %191 = dma.vmem_to_hbm [thread:$0]  %s186_s2, 256, %s352_s5, [#allocation4], %s289_s4, %s289_s4, %s290_s11  }
 0x1ae   :  { %281 = dma.done.wait [#allocation4], 256  }
 0x1af   :  { %282 = vsyncadd [#allocation4], 4294967040 }
 0x1b0   :  { %195 = vsyncpa [#allocation3], 1 }
 0x1b1   :  { %196 = vsyncpa [#allocation4], 1 }

</bundles_post_ra>
